<compile_context>
chip_gen: v7x
topology: tpu7x:2x2x1
jax: 0.10.0
libtpu: 0.0.40
codegen_flags: <defaults>
</compile_context>

<pallas_src>
import functools
import math

import jax
import jax.numpy as jnp
from jax.experimental import pallas as pl
from jax.experimental.pallas import tpu as pltpu

CONST = 10000

LANES = 128
# Per-step tile budget (~6 live tiles: x, pe, out, each double-buffered) and
# scoped-VMEM limit.  48 MiB limit fits under v7x's 64 MiB physical VMEM and
# is comfortably inside v5e/v6e's 128 MiB.
_TILE_BUDGET_BYTES = 24 * 1024 * 1024
_VMEM_LIMIT_BYTES = 48 * 1024 * 1024


def positional_encoder_kernel(x_ref, pe_ref, o_ref, *, scale):
    # x_ref:  (1, tile_r, C)   one batch row, tile_r lane-dense rows
    # pe_ref: (tile_r, C)      shared PE rows for this tile (broadcast over batch)
    # o_ref:  (1, tile_r, C)
    # `scale` is a weak-typed python float, so the compute stays in x's dtype
    # (bf16 on v6e/v7x, f32 otherwise).
    o_ref[...] = (x_ref[...] * scale + pe_ref[...]).astype(o_ref.dtype)


def make_positional_embed(max_len, model_size, dtype=jnp.float32):
    """Same table as the PyTorch __init__ loops: sin on even dims, cos on odd."""
    pos = jnp.arange(max_len, dtype=jnp.float32)[:, None]           # (L, 1)
    j = jnp.arange(0, model_size, 2, dtype=jnp.float32)[None, :]    # (1, D/2)
    angle = pos / (CONST ** (j / model_size))
    pe = jnp.zeros((max_len, model_size), jnp.float32)
    pe = pe.at[:, 0::2].set(jnp.sin(angle))
    pe = pe.at[:, 1::2].set(jnp.cos(angle))
    return pe.astype(dtype)


def _choose_row_tile(R, C, itemsize, budget_bytes=_TILE_BUDGET_BYTES):
    """Largest legal row tile whose double-buffered footprint fits the budget.

    Per grid step the pipeline keeps ~6 tiles live (x, pe, out, each double
    buffered), so we require 6 * tile_r * C * itemsize <= budget.
    """
    max_rows = max(8, budget_bytes // (6 * C * itemsize))
    if R <= max_rows:
        return R                 # full extent: always a legal block, fewest steps
    best = 0
    t = 8
    while t <= max_rows:
        if R % t == 0:
            best = t
        t += 8
    if best:
        return best
    # No 8-aligned divisor fits the budget: use an 8-aligned non-dividing tile;
    # the trailing partial block is padded and its OOB output writes discarded
    # (safe for a purely elementwise op).
    return (max_rows // 8) * 8


def positional_encoder(x, positional_embed):
    """x: (B, S, D); positional_embed: (max_len, D) with max_len >= S."""
    B, S, D = x.shape
    max_len, D_pe = positional_embed.shape
    assert D == D_pe, "model_size mismatch between x and positional_embed"
    assert S <= max_len, "sequence longer than max_len"

    scale = math.sqrt(D)

    # Pre-slice the PE table to the active sequence length and match x's dtype:
    #  * the (S, D) slab is a legal full-extent block even when S % 8 != 0,
    #  * PE HBM reads / VMEM buffers shrink when x is bf16.
    pe = positional_embed[:S].astype(x.dtype)

    # Lane-dense layout: the op is elementwise and PE is shared across the
    # batch, so flatten (S, D) into rows of 128 lanes whenever possible.  This
    # avoids masked partial stores when D < 128 and keeps vregs full for any D.
    if (S * D) % LANES == 0:
        R, C = (S * D) // LANES, LANES
        x2 = x.reshape(B, R, C)
        pe2 = pe.reshape(R, C)
    else:
        R, C = S, D              # fallback: last dim == full D (always legal)
        x2, pe2 = x, pe

    itemsize = jnp.dtype(x.dtype).itemsize
    tile_r = _choose_row_tile(R, C, itemsize)

    # Grid: row tiles outermost, batch innermost.  With batch innermost the PE
    # block index is constant across consecutive steps, so Pallas skips the
    # redundant PE re-fetch for every batch row.
    grid = (pl.cdiv(R, tile_r), B)

    kernel = functools.partial(positional_encoder_kernel, scale=scale)

    out2 = pl.pallas_call(
        kernel,
        out_shape=jax.ShapeDtypeStruct((B, R, C), x.dtype),
        grid_spec=pltpu.PrefetchScalarGridSpec(
            num_scalar_prefetch=0,
            grid=grid,
            in_specs=[
                # x tile: one batch row, tile_r lane-dense rows.
                pl.BlockSpec((1, tile_r, C), lambda r, b: (b, r, 0)),
                # PE tile: depends only on the row-tile index (reused across b).
                pl.BlockSpec((tile_r, C), lambda r, b: (r, 0)),
            ],
            out_specs=pl.BlockSpec((1, tile_r, C), lambda r, b: (b, r, 0)),
        ),
        compiler_params=pltpu.CompilerParams(
            dimension_semantics=("parallel", "parallel"),
            vmem_limit_bytes=_VMEM_LIMIT_BYTES,
        ),
    )(x2, pe2)

    return out2.reshape(B, S, D)


if __name__ == "__main__":
    # Small shapes consistent with the module: (batch, seq, model_size)
    B, S, D = 2, 8, 32
    MAX_LEN = 16

    key = jax.random.PRNGKey(0)
    x = jax.random.normal(key, (B, S, D), dtype=jnp.float32)

    pe = make_positional_embed(MAX_LEN, D, dtype=jnp.float32)

    out = jax.block_until_ready(positional_encoder(x, pe))

    # Reference (eval-mode forward): x * sqrt(D) + pe[:S], dropout = identity.
    ref = x * math.sqrt(D) + pe[None, :S, :]
    assert out.shape == (B, S, D)
    assert jnp.allclose(out, ref, atol=1e-5, rtol=1e-5)

    print("KERNEL_OK")
</pallas_src>

<mosaic_0001>
module attributes {stable_mosaic.version = 11 : i64} {
  func.func @positional_encoder_kernel(%arg0: i32, %arg1: i32, %arg2: memref<1x2x128xf32, #tpu.memory_space<vmem>>, %arg3: memref<2x128xf32, #tpu.memory_space<vmem>>, %arg4: memref<1x2x128xf32, #tpu.memory_space<vmem>>) attributes {dimension_semantics = [#tpu.dimension_semantics<parallel>, #tpu.dimension_semantics<parallel>], iteration_bounds = array<i64: 1, 2>, scalar_prefetch = 0 : i64, scratch_operands = 0 : i64, tpu.core_type = #tpu.core_type<tc>, window_params = [{transform_indices = @transform_0, window_bounds = array<i64: 1, 2, 128>}, {transform_indices = @transform_1, window_bounds = array<i64: 2, 128>}, {transform_indices = @transform_2, window_bounds = array<i64: 1, 2, 128>}]} {
    %c0 = arith.constant 0 : index
    %c0_0 = arith.constant 0 : index
    %c0_1 = arith.constant 0 : index
    %0 = vector.load %arg2[%c0, %c0_0, %c0_1] : memref<1x2x128xf32, #tpu.memory_space<vmem>>, vector<1x2x128xf32>
    %cst = arith.constant 5.65685415 : f32
    %1 = vector.broadcast %cst : f32 to vector<1x2x128xf32>
    %2 = arith.mulf %0, %1 : vector<1x2x128xf32>
    %c0_2 = arith.constant 0 : index
    %c0_3 = arith.constant 0 : index
    %3 = vector.load %arg3[%c0_2, %c0_3] : memref<2x128xf32, #tpu.memory_space<vmem>>, vector<2x128xf32>
    %4 = vector.shape_cast %3 : vector<2x128xf32> to vector<1x2x128xf32>
    %5 = arith.addf %2, %4 : vector<1x2x128xf32>
    %c0_4 = arith.constant 0 : index
    %c0_5 = arith.constant 0 : index
    %c0_6 = arith.constant 0 : index
    %6 = vector.load %arg4[%c0_4, %c0_5, %c0_6] : memref<1x2x128xf32, #tpu.memory_space<vmem>>, vector<1x2x128xf32>
    tpu.vector_store %arg4[%c0_4, %c0_5, %c0_6], %5 {strides = array<i32>} : memref<1x2x128xf32, #tpu.memory_space<vmem>>, vector<1x2x128xf32>,
    return
  }
  func.func @transform_0(%arg0: i32, %arg1: i32) -> (i32, i32, i32) {
    %c0_i32 = arith.constant 0 : i32
    %c0_i32_0 = arith.constant 0 : i32
    return %arg1, %arg0, %c0_i32 : i32, i32, i32
  }
  func.func @transform_1(%arg0: i32, %arg1: i32) -> (i32, i32) {
    %c0_i32 = arith.constant 0 : i32
    %c0_i32_0 = arith.constant 0 : i32
    return %arg0, %c0_i32 : i32, i32
  }
  func.func @transform_2(%arg0: i32, %arg1: i32) -> (i32, i32, i32) {
    %c0_i32 = arith.constant 0 : i32
    %c0_i32_0 = arith.constant 0 : i32
    return %arg1, %arg0, %c0_i32 : i32, i32, i32
  }
}

</mosaic_0001>

<bundles_post_ra>
// kernel: tpu_custom_call.1
= control target key start
LH: loop header
LB: loop body
LE: loop exit
PB: predicated region body
PF: predicated region fallthrough
CT: control target
= control target key end

     0   :  { %7 = vsyncpa [#allocation3], 0  ;;  %s690_s0 = inlined_call_operand.hbm [shape: f32[2,2,128], index: 0, kind: input, shape index: {}]   ;;  %s691_s1 = inlined_call_operand.vmem [shape: f32[2,128], index: 1, kind: input, shape index: {}]   ;;  %s692_s2 = inlined_call_operand.hbm [shape: f32[2,2,128], index: 2, kind: output, shape index: {}]  }
   0x1   :  { %9 = vsyncpa [#allocation3 + $0x1], 0 }
   0x2   :  { %10 = vsyncpa [#allocation4], 0 }
   0x3   :  { %12 = vsyncpa [#allocation4 + $0x1], 0  ;;  %s515_s9 = smov 0   ;;  %s517_s10 = smov 0  }
   0x4   :  { %s519_s11 = smov 0   ;;  %s521_s12 = smov 0  }
   0x5   :  { %s523_s13 = smov 0   ;;  %s525_s14 = smov 0  }
   0x6 LB: > { %s308_s15 = sadd.s32 4294967295, %s496_s14   ;;  %s309_s16 = sadd.s32 4294967294, %s496_s14   ;;  %s496_s14 = sphi %s525_s14, %s18_s14   ;;  %s492_s13 = sphi %s523_s13, %s708_s13   ;;  %s488_s12 = sphi %s521_s12, %s707_s12   ;;  %s484_s11 = sphi %s519_s11, %s706_s11   ;;  %s480_s10 = sphi %s517_s10, %s705_s10   ;;  %s476_s9 = sphi %s515_s9, %s704_s9  }
   0x7   : > { %s27_s17 = sadd.s32 1, %s492_s13  ;;  %s39_s18 = sadd.s32 1, %s484_s11 }
   0x8   : > { %p28_p0 = scmp.ge.s32.totalorder %s27_s17, 2  ;;  %p46_p1 = scmp.ne.s32.totalorder %s484_s11, %s480_s10 }
   0x9   : > { %p47_p2 = scmp.eq.s32.totalorder %s496_s14, 0  ;;  %p52_p3 = scmp.ne.s32.totalorder %s480_s10, %s476_s9 }
   0xa   : > { %s710_s17 = smov (%p28_p0, %s27_s17), 0  ;;  %p53_p5 = scmp.eq.s32.totalorder %s308_s15, 0 }
   0xb   : > { %p556_p4 = por %p47_p2, %p46_p1  ;;  %s34_s20 = ssub.s32 %s492_s13, %s710_s17 }
   0xc   : > { %p104_p6 = scmp.eq.s32.totalorder %s308_s15, 1  ;;  %p37_p7 = scmp.eq.s32.totalorder %s34_s20, 0 }
   0xd   : > { %p562_p8 = por %p53_p5, %p52_p3  ;;  %p110_p10 = scmp.eq.s32.totalorder %s309_s16, 1 }
   0xe   : > { %p566_p9 = por %p104_p6, %p46_p1  ;;  %p334_p13 = scmp.lt.s32.totalorder %s496_s14, 2 }
   0xf   : > { %s571_s23 = scalar_select %p37_p7, %s484_s11, %s39_s18  }
  0x10   : > { %s696_s22 = scalar_select %p566_p9, 1, 0 }
  0x11   : > { %p573_p11 = por %p110_p10, %p52_p3  ;;  %s137_s25 = sand.u32 1, %s484_s11  }
  0x12   : > { %s313_s26 = sshll.u32 %s137_s25, 1  ;;  %s314_s27 = sshll.u32 %s492_s13, 5 }
  0x13   : > { %s697_s24 = scalar_select %p573_p11, 1, 0 }
  0x14   : > { %s584_s30 = scalar_lea.hbm %s690_s0, %s314_s27  ;;  %s141_s3 = scalar_lea.vmem [#allocation2], %s313_s26 }
  0x15   : > { %s149_s4 = sshll.u32 %s141_s3, 4  ;;  %p590_p0 = pnand %p334_p13, %p556_p4  ;;  %s586_s4 = int_to_ptr.vmem [resolvable:$true] %s149_s4 }
  0x16   : > { %s138_s6 = scalar_lea.sflag [#allocation3], %s137_s25  ;;  %s384_s7 = scalar_lea.hbm %s584_s30, 32 }
  0x17   : > { %p385_p3 = scmp.ne.s32.totalorder %s584_s30, %s384_s7  ;;  %p386_p5 = pneg %p590_p0 }
  0x18   : > { %s389_s16 = scalar_lea.hbm %s690_s0, 64  ;;  %p390_p4 = scmp.lt.u32.totalorder %s584_s30, %s690_s0 }
  0x19   : > { %p387_p6 = pnand %p386_p5, %p385_p3  ;;  %p391_p10 = scmp.lt.u32.totalorder %s389_s16, %s384_s7 }
  0x1a   : > { %p393_p12 = scmp.lt.u32.totalorder %s384_s7, %s584_s30 }
  0x1b   : > { %p388_p7 = pneg %p387_p6  ;;  %p392_p13 = por %p391_p10, %p390_p4 }
  0x1d   : > { %p394_p1 = por %p393_p12, %p392_p13 }
  0x1f   : > { %p395_p2 = pnand %p394_p1, %p388_p7 }
  0x21   : > { %398 = shalt.err (!%p395_p2)
}
  0x22   : > { %s399_s20 = scalar_lea.vmem %s586_s4, 32  ;;  %s498_s25 = smov [#allocation2]  }
  0x23   : > { %p400_p3 = scmp.ne.s32.totalorder %s586_s4, %s399_s20  ;;  %s404_s26 = sshll.u32 %s498_s25, 4  ;;  %s405_s26 = int_to_ptr.vmem [resolvable:$false] %s404_s26 }
  0x24   : > { %s406_s27 = scalar_lea.vmem %s405_s26, 64  ;;  %p407_p9 = scmp.lt.s32.totalorder %s586_s4, %s405_s26 }
  0x25   : > { %p402_p6 = pnand %p400_p3, %p386_p5  ;;  %p408_p4 = scmp.lt.s32.totalorder %s406_s27, %s399_s20 }
  0x27   : > { %p403_p11 = pneg %p402_p6  ;;  %p409_p10 = por %p408_p4, %p407_p9 }
  0x29   : > { %p410_p12 = pnand %p409_p10, %p403_p11 }
  0x2b   : > { %413 = shalt.err (!%p410_p12)
}
  0x2c   : > { %329 = dma.hbm_to_vmem [thread:$0]  (!%p590_p0), %s584_s30, 32, %s586_s4, %s138_s6  }
  0x2d   : > { %p699_p1 = scmp.lt.s32.totalorder %s496_s14, 3  ;;  %p700_p2 = scmp.ge.s32.totalorder %s496_s14, 1 }
  0x2f   : > { %p155_p5 = pnand %p700_p2, %p699_p1 }
  0x30   : > { %s626_s28 = sand.u32 (!%p155_p5), 1, %s480_s10  }
  0x31   : > { %158 = sbr.rel (%p155_p5) target bundleno = 83 (0x53), region = 28  ;;  %s316_s29 = sshll.u32 (!%p155_p5), %s626_s28, 1 }
  0x32   : > { %s161_s3 = scalar_lea.sflag (!%p155_p5), [#allocation3], %s626_s28  ;;  %s164_s7 = scalar_lea.vmem (!%p155_p5), [#allocation2], %s316_s29 }
  0x38   : > { %467 = dma.done.wait (%p562_p8), %s161_s3, 32  }
  0x39   : > { %469 = vsyncadd (%p562_p8), %s161_s3, 4294967264  ;;  %v193_v0 = vld [vmem:[%s164_s7] sm:$0x3]  ;;  %s188_s5 = scalar_lea.vmem [#allocation5], %s316_s29  ;;  %s319_s8 = sshll.u32 %s488_s12, 5 }
  0x3a   : > { %v195_v1 = vld [vmem:[%s691_s1] sm:$0x3]  ;;  %s213_s6 = sshll.u32 %s188_s5, 4  ;;  %v194_v2 = vmul.f32 5.656854, %v193_v0  ;;  %s643_s21 = scalar_lea.hbm %s692_s2, %s319_s8  ;;  %s638_s6 = int_to_ptr.vmem [resolvable:$true] %s213_s6 }
  0x3b   : > { %s199_s18 = scalar_lea.sflag [#allocation4], %s626_s28  ;;  %s414_s19 = scalar_lea.vmem %s638_s6, 32 }
  0x3c   : > { %v196_v3 = vadd.f32 %v195_v1, %v194_v2  ;;  %p415_p8 = scmp.ne.s32.totalorder %s638_s6, %s414_s19  ;;  %p701_p9 = scmp.ne.s32.totalorder %s696_s22, 0 }
  0x3d   : > { %s499_s12 = smov [#allocation5]  }
  0x3e   : > { %197 = vst [vmem:[%s188_s5] sm:$0x3] %v196_v3  ;;  %p416_p11 = pnand %p415_p8, %p701_p9  ;;  %s418_s20 = sshll.u32 %s499_s12, 4  ;;  %s419_s20 = int_to_ptr.vmem [resolvable:$false] %s418_s20 }
  0x3f   : > { %s420_s25 = scalar_lea.vmem %s419_s20, 64  ;;  %p421_p7 = scmp.lt.s32.totalorder %s638_s6, %s419_s20 }
  0x40   : > { %p417_p0 = pneg %p416_p11  ;;  %p422_p13 = scmp.lt.s32.totalorder %s420_s25, %s414_s19 }
  0x42   : > { %p423_p3 = por %p422_p13, %p421_p7 }
  0x44   : > { %p424_p6 = pnand %p423_p3, %p417_p0 }
  0x46   : > { %427 = shalt.err (!%p424_p6)
}
  0x47   : > { %s428_s26 = scalar_lea.hbm %s643_s21, 32  ;;  %s432_s29 = scalar_lea.hbm %s692_s2, 64 }
  0x48   : > { %p429_p4 = scmp.ne.s32.totalorder %s643_s21, %s428_s26  ;;  %p433_p1 = scmp.lt.u32.totalorder %s643_s21, %s692_s2 }
  0x49   : > { %p434_p2 = scmp.lt.u32.totalorder %s432_s29, %s428_s26  ;;  %p436_p8 = scmp.lt.u32.totalorder %s428_s26, %s643_s21 }
  0x4a   : > { %p430_p10 = pnand %p429_p4, %p701_p9 }
  0x4b   : > { %p435_p5 = por %p434_p2, %p433_p1 }
  0x4c   : > { %p431_p12 = pneg %p430_p10 }
  0x4d   : > { %p437_p11 = por %p436_p8, %p435_p5 }
  0x4f   : > { %p438_p0 = pnand %p437_p11, %p431_p12 }
  0x51   : > { %441 = shalt.err (!%p438_p0)
}
  0x52   : > { %324 = dma.vmem_to_hbm [thread:$0]  (%p701_p9), %s638_s6, 32, %s643_s21, %s199_s18  }
  0x53 PF: > { %s225_s30 = sand.u32 1, %s476_s9   ;;  %p702_p7 = scmp.ne.s32.totalorder %s697_s24, 0 }
  0x54   : > { %p703_p13 = scmp.ge.s32.totalorder %s496_s14, 2  ;;  %s226_s4 = scalar_lea.sflag [#allocation4], %s225_s30 }
  0x56   : > { %p331_p3 = pnand %p703_p13, %p702_p7 }
  0x58   : > { %471 = dma.done.wait (!%p331_p3), %s226_s4, 32  }
  0x59   : > { %473 = vsyncadd (!%p331_p3), %s226_s4, 4294967264  ;;  %s18_s14 = sadd.s32 1, %s496_s14   ;;  %s704_s9 = smov %s480_s10 }
  0x5a   : > { %p15_p6 = scmp.ge.s32.totalorder %s18_s14, 4   ;;  %s705_s10 = smov %s484_s11 }
  0x5b   : > { %s706_s11 = smov %s571_s23  ;;  %s707_s12 = smov %s492_s13 }
  0x5c   : > { %s708_s13 = smov %s710_s17  ;;  %17 = sbr.rel (!%p15_p6) target bundleno = 6 (0x6), region = 76 }
  0x63   :  { %231 = vsyncpa [#allocation3], 1 }
  0x64   :  { %233 = vsyncpa [#allocation3 + $0x1], 1 }
  0x65   :  { %234 = vsyncpa [#allocation4], 1 }
  0x66   :  { %236 = vsyncpa [#allocation4 + $0x1], 1 }

</bundles_post_ra>
